<compile_context>
chip_gen: v7x
topology: tpu7x:2x2x1
jax: 0.10.0
libtpu: 0.0.40
codegen_flags: <defaults>
</compile_context>

<pallas_src>
import math

import jax
import jax.numpy as jnp
from jax.experimental import pallas as pl
from jax.experimental.pallas import tpu as pltpu


_GELU_C = math.sqrt(2.0 / math.pi)


def _gelu_tanh(h):
    # torch.nn.GELU(approximate='tanh'):
    #   0.5 * x * (1 + tanh(sqrt(2/pi) * (x + 0.044715 * x^3)))
    # refactored to save one multiply per element.
    return 0.5 * h * (1.0 + jnp.tanh(_GELU_C * h * (1.0 + 0.044715 * h * h)))


def _fullk_kernel(x_ref, w_ref, o_ref):
    # x_ref: (tm, Kp)   w_ref: (2, Kp, tn) = stacked [wi_0.T, wi_1.T]   o_ref: (tm, tn)
    x = x_ref[...]
    h0 = jnp.dot(x, w_ref[0], preferred_element_type=jnp.float32)
    h1 = jnp.dot(x, w_ref[1], preferred_element_type=jnp.float32)
    o_ref[...] = (_gelu_tanh(h0) * h1).astype(o_ref.dtype)


def _ktiled_kernel(x_ref, w_ref, o_ref, acc0_ref, acc1_ref):
    # Fallback when d_model does not fit as a single K tile.
    # x_ref: (tm, tk)   w_ref: (2, tk, tn)   o_ref: (tm, tn)   acc*: (tm, tn) f32
    k = pl.program_id(2)
    x = x_ref[...]
    p0 = jnp.dot(x, w_ref[0], preferred_element_type=jnp.float32)
    p1 = jnp.dot(x, w_ref[1], preferred_element_type=jnp.float32)

    @pl.when(k == 0)
    def _():
        acc0_ref[...] = p0          # no zero-init + RMW on the first K step
        acc1_ref[...] = p1

    @pl.when(k > 0)
    def _():
        acc0_ref[...] += p0
        acc1_ref[...] += p1

    @pl.when(k == pl.num_programs(2) - 1)
    def _():
        o_ref[...] = (_gelu_tanh(acc0_ref[...]) * acc1_ref[...]).astype(o_ref.dtype)


def _round_up(x, m):
    return ((x + m - 1) // m) * m


def _vmem_budget_bytes():
    # ~70% of physical VMEM; leaves headroom for Mosaic internal scratch.
    try:
        cap = pltpu.get_tpu_info().vmem_capacity_bytes
    except Exception:
        cap = 64 << 20          # conservative fallback (v7x per-TensorCore)
    return int(cap * 0.70)


def _auto_tiles(M, K, N, in_b, w_b, out_b, budget, m_align):
    """Pick (tm, tn, tk) filling the VMEM budget; prefer a single full-K tile."""
    Kp = _round_up(K, 128)
    tm_cap = _round_up(M, m_align)
    tn_cap = _round_up(N, 128)

    def fullk_bytes(tm, tn):
        return (2 * tm * Kp * in_b          # x tile, double buffered
                + 2 * 2 * Kp * tn * w_b     # stacked weight tile, double buffered
                + 2 * tm * tn * out_b)      # output tile, double buffered

    # Preferred: grid_k == 1 (fused epilogue, no accumulators, DMA dedup).
    for tn in (2048, 1024, 512, 256, 128):
        tn = min(tn, tn_cap)
        for tm in (1024, 512, 256, 128):
            tm = min(tm, tm_cap)
            if fullk_bytes(tm, tn) <= budget:
                return tm, tn, Kp
    # Fallback: K-tiled reduction (very large d_model).
    for tk in (1024, 512, 256, 128):
        tk = min(tk, Kp)
        for tn in (1024, 512, 256, 128):
            tn = min(tn, tn_cap)
            for tm in (512, 256, 128, 64, 32, 16, m_align):
                tm = min(max(tm, m_align), tm_cap)
                b = (2 * tm * tk * in_b + 4 * tk * tn * w_b
                     + 2 * tm * tn * out_b + 2 * tm * tn * 4)
                if b <= budget:
                    return tm, tn, tk
    return min(m_align, tm_cap), min(128, tn_cap), min(128, Kp)


def flash_t5_dense_gated_act(hidden_states, w0_t, w1_t, *, tm=None, tn=None, tk=None,
                             out_dtype=None, compute_dtype=None):
    """hidden_states: (B, S, d_model); w0_t / w1_t: (d_model, d_ff) = nn.Linear.weight.T"""
    B, S, d_model = hidden_states.shape
    d_ff = w0_t.shape[1]
    M = B * S

    if compute_dtype is not None:
        hidden_states = hidden_states.astype(compute_dtype)
        w0_t = w0_t.astype(compute_dtype)
        w1_t = w1_t.astype(compute_dtype)
    if out_dtype is None:
        out_dtype = hidden_states.dtype

    in_b = hidden_states.dtype.itemsize
    w_b = w0_t.dtype.itemsize
    out_b = jnp.dtype(out_dtype).itemsize
    # bf16 vregs pack 16 sublanes; keep tm on the native packing for sub-32-bit dtypes.
    m_align = 8 if in_b >= 4 else (16 if in_b == 2 else 32)

    budget = _vmem_budget_bytes()

    if tm is None or tn is None or tk is None:
        a_tm, a_tn, a_tk = _auto_tiles(M, d_model, d_ff, in_b, w_b, out_b, budget, m_align)
        tm = a_tm if tm is None else tm
        tn = a_tn if tn is None else tn
        tk = a_tk if tk is None else tk

    # Clamp + align to hardware tiling.
    tm = max(m_align, min(_round_up(tm, m_align), _round_up(M, m_align)))
    tn = max(128, min(_round_up(tn, 128), _round_up(d_ff, 128)))
    tk = max(128, min(_round_up(tk, 128), _round_up(d_model, 128)))

    Mp = _round_up(M, tm)
    Np = _round_up(d_ff, tn)
    Kp = _round_up(d_model, tk)
    grid_m, grid_n, grid_k = Mp // tm, Np // tn, Kp // tk

    # Operand prep.  NOTE: for fixed parameters the weight stack/pad is
    # constant-folded / CSE'd when this wrapper is jitted; in production cache
    # the stacked+padded (2, Kp, Np) weight once outside the hot path.
    x2d = hidden_states.reshape(M, d_model)
    if (Mp, Kp) != (M, d_model):
        x2d = jnp.pad(x2d, ((0, Mp - M), (0, Kp - d_model)))
    w01 = jnp.stack([w0_t, w1_t])                                   # (2, d_model, d_ff)
    if (Kp, Np) != (d_model, d_ff):
        w01 = jnp.pad(w01, ((0, 0), (0, Kp - d_model), (0, Np - d_ff)))

    flops = 4 * Mp * Kp * Np + 12 * Mp * Np
    trans = Mp * Np

    if grid_k == 1:
        # Single K tile: fused matmul + gated-GELU epilogue, no accumulators.
        # Put the LARGER operand on the axis whose block index is invariant
        # along the inner grid axis so it streams from HBM exactly once.
        w_stream = 2 * Kp * Np * w_b
        x_stream = Mp * Kp * in_b
        if w_stream > x_stream:
            grid = (grid_n, grid_m)                     # inner axis = m -> weights held
            x_spec = pl.BlockSpec((tm, Kp), lambda j, i: (i, 0))
            w_spec = pl.BlockSpec((2, Kp, tn), lambda j, i: (0, 0, j))
            o_spec = pl.BlockSpec((tm, tn), lambda j, i: (i, j))
            bytes_accessed = w_stream + x_stream * grid_n + Mp * Np * out_b
        else:
            grid = (grid_m, grid_n)                     # inner axis = n -> activations held
            x_spec = pl.BlockSpec((tm, Kp), lambda i, j: (i, 0))
            w_spec = pl.BlockSpec((2, Kp, tn), lambda i, j: (0, 0, j))
            o_spec = pl.BlockSpec((tm, tn), lambda i, j: (i, j))
            bytes_accessed = x_stream + w_stream * grid_m + Mp * Np * out_b

        vmem_need = 2 * tm * Kp * in_b + 4 * Kp * tn * w_b + 2 * tm * tn * out_b
        vmem_limit = int(min(max(int(vmem_need * 1.25), 16 << 20), budget))

        out2d = pl.pallas_call(
            _fullk_kernel,
            out_shape=jax.ShapeDtypeStruct((Mp, Np), out_dtype),
            grid_spec=pltpu.PrefetchScalarGridSpec(
                num_scalar_prefetch=0,
                grid=grid,
                in_specs=[x_spec, w_spec],
                out_specs=o_spec,
            ),
            compiler_params=pltpu.CompilerParams(
                dimension_semantics=("parallel", "parallel"),
                vmem_limit_bytes=vmem_limit,
            ),
            cost_estimate=pl.CostEstimate(flops=flops, transcendentals=trans,
                                          bytes_accessed=int(bytes_accessed)),
        )(x2d, w01)
    else:
        # K-tiled reduction fallback (huge d_model or user-forced tk).
        vmem_need = (2 * tm * tk * in_b + 4 * tk * tn * w_b
                     + 2 * tm * tn * out_b + 2 * tm * tn * 4)
        vmem_limit = int(min(max(int(vmem_need * 1.25), 16 << 20), budget))
        bytes_accessed = (Mp * Kp * in_b * grid_n + 2 * Kp * Np * w_b * grid_m
                          + Mp * Np * out_b)

        out2d = pl.pallas_call(
            _ktiled_kernel,
            out_shape=jax.ShapeDtypeStruct((Mp, Np), out_dtype),
            grid_spec=pltpu.PrefetchScalarGridSpec(
                num_scalar_prefetch=0,
                grid=(grid_m, grid_n, grid_k),
                in_specs=[
                    pl.BlockSpec((tm, tk), lambda i, j, k: (i, k)),
                    pl.BlockSpec((2, tk, tn), lambda i, j, k: (0, k, j)),
                ],
                out_specs=pl.BlockSpec((tm, tn), lambda i, j, k: (i, j)),
                scratch_shapes=[
                    pltpu.VMEM((tm, tn), jnp.float32),
                    pltpu.VMEM((tm, tn), jnp.float32),
                ],
            ),
            compiler_params=pltpu.CompilerParams(
                dimension_semantics=("parallel", "parallel", "arbitrary"),
                vmem_limit_bytes=vmem_limit,
            ),
            cost_estimate=pl.CostEstimate(flops=flops, transcendentals=trans,
                                          bytes_accessed=int(bytes_accessed)),
        )(x2d, w01)

    if (Mp, Np) != (M, d_ff):
        out2d = out2d[:M, :d_ff]
    return out2d.reshape(B, S, d_ff)


def reference(hidden_states, w0_t, w1_t):
    x = hidden_states.astype(jnp.float32)
    h0 = jnp.einsum("bsd,df->bsf", x, w0_t.astype(jnp.float32))
    h1 = jnp.einsum("bsd,df->bsf", x, w1_t.astype(jnp.float32))
    c = math.sqrt(2.0 / math.pi)
    gelu = 0.5 * h0 * (1.0 + jnp.tanh(c * (h0 + 0.044715 * h0 ** 3)))
    return gelu * h1


def _make_inputs(key, batch, seq, d_model, d_ff, dtype=jnp.float32):
    k_x, k_w0, k_w1 = jax.random.split(key, 3)
    x = jax.random.normal(k_x, (batch, seq, d_model), dtype=dtype)
    # nn.Linear(d_model, d_ff, bias=False).weight has shape (d_ff, d_model);
    # pre-transpose to (d_model, d_ff).
    s = 1.0 / math.sqrt(d_model)
    w0 = jax.random.normal(k_w0, (d_ff, d_model), dtype=dtype) * s
    w1 = jax.random.normal(k_w1, (d_ff, d_model), dtype=dtype) * s
    return x, w0.T, w1.T


if __name__ == "__main__":
    key = jax.random.PRNGKey(0)
    ks = jax.random.split(key, 4)

    # A: small aligned config, auto tiles -> fused single-K-tile path.
    x, w0_t, w1_t = _make_inputs(ks[0], batch=2, seq=16, d_model=128, d_ff=256)
    out = flash_t5_dense_gated_act(x, w0_t, w1_t)
    jax.block_until_ready(out)
    assert out.shape == (2, 16, 256)
    assert jnp.allclose(out, reference(x, w0_t, w1_t), atol=1e-3, rtol=1e-3)

    # B: ragged shapes + tiny explicit tiles -> K-tiled accumulator path
    #    (exercises the =/+= init and the @pl.when finalize).
    xb, w0b, w1b = _make_inputs(ks[1], batch=2, seq=13, d_model=200, d_ff=320)
    outb = flash_t5_dense_gated_act(xb, w0b, w1b, tm=8, tn=128, tk=128)
    jax.block_until_ready(outb)
    assert outb.shape == (2, 13, 320)
    assert jnp.allclose(outb, reference(xb, w0b, w1b), atol=1e-3, rtol=1e-3)

    # C: ragged shapes, auto tiles -> full-K path with M/K/N padding + output slice.
    xc, w0c, w1c = _make_inputs(ks[2], batch=3, seq=10, d_model=200, d_ff=320)
    outc = flash_t5_dense_gated_act(xc, w0c, w1c)
    jax.block_until_ready(outc)
    assert outc.shape == (3, 10, 320)
    assert jnp.allclose(outc, reference(xc, w0c, w1c), atol=1e-3, rtol=1e-3)

    # D: bf16 activations/weights (MXU bf16 path with f32 accumulation).
    xd, w0d, w1d = _make_inputs(ks[3], batch=2, seq=16, d_model=128, d_ff=256,
                                dtype=jnp.bfloat16)
    outd = flash_t5_dense_gated_act(xd, w0d, w1d)
    jax.block_until_ready(outd)
    assert outd.shape == (2, 16, 256)
    assert jnp.allclose(outd.astype(jnp.float32), reference(xd, w0d, w1d),
                        atol=5e-2, rtol=5e-2)

    print("KERNEL_OK")
</pallas_src>

<mosaic_0001>
module attributes {stable_mosaic.version = 11 : i64} {
  func.func @_fullk_kernel(%arg0: i32, %arg1: i32, %arg2: memref<32x128xf32, #tpu.memory_space<vmem>>, %arg3: memref<2x128x256xf32, #tpu.memory_space<vmem>>, %arg4: memref<32x256xf32, #tpu.memory_space<vmem>>) attributes {dimension_semantics = [#tpu.dimension_semantics<parallel>, #tpu.dimension_semantics<parallel>], iteration_bounds = array<i64: 1, 1>, scalar_prefetch = 0 : i64, scratch_operands = 0 : i64, tpu.core_type = #tpu.core_type<tc>, window_params = [{transform_indices = @transform_0, window_bounds = array<i64: 32, 128>}, {transform_indices = @transform_1, window_bounds = array<i64: 2, 128, 256>}, {transform_indices = @transform_2, window_bounds = array<i64: 32, 256>}]} {
    %c0 = arith.constant 0 : index
    %c0_0 = arith.constant 0 : index
    %0 = vector.load %arg2[%c0, %c0_0] : memref<32x128xf32, #tpu.memory_space<vmem>>, vector<32x128xf32>
    %c0_1 = arith.constant 0 : index
    %c0_2 = arith.constant 0 : index
    %c0_3 = arith.constant 0 : index
    %1 = vector.load %arg3[%c0_1, %c0_2, %c0_3] : memref<2x128x256xf32, #tpu.memory_space<vmem>>, vector<1x128x256xf32>
    %2 = vector.shape_cast %1 : vector<1x128x256xf32> to vector<128x256xf32>
    %cst = arith.constant dense<0.000000e+00> : vector<32x256xf32>
    %3 = tpu.matmul %0, %2, %cst {dimension_numbers = #tpu.dot_dimension_numbers<[1], [0], [0], [1], [0, 0, 1, 1], [], []>} : vector<32x128xf32>, vector<128x256xf32>, vector<32x256xf32> -> vector<32x256xf32>
    %c1 = arith.constant 1 : index
    %c0_4 = arith.constant 0 : index
    %c0_5 = arith.constant 0 : index
    %4 = vector.load %arg3[%c1, %c0_4, %c0_5] : memref<2x128x256xf32, #tpu.memory_space<vmem>>, vector<1x128x256xf32>
    %5 = vector.shape_cast %4 : vector<1x128x256xf32> to vector<128x256xf32>
    %cst_6 = arith.constant dense<0.000000e+00> : vector<32x256xf32>
    %6 = tpu.matmul %0, %5, %cst_6 {dimension_numbers = #tpu.dot_dimension_numbers<[1], [0], [0], [1], [0, 0, 1, 1], [], []>} : vector<32x128xf32>, vector<128x256xf32>, vector<32x256xf32> -> vector<32x256xf32>
    %cst_7 = arith.constant 5.000000e-01 : f32
    %7 = vector.broadcast %cst_7 : f32 to vector<32x256xf32>
    %8 = arith.mulf %7, %3 : vector<32x256xf32>
    %cst_8 = arith.constant 0.797884583 : f32
    %9 = vector.broadcast %cst_8 : f32 to vector<32x256xf32>
    %10 = arith.mulf %9, %3 : vector<32x256xf32>
    %cst_9 = arith.constant 4.471500e-02 : f32
    %11 = vector.broadcast %cst_9 : f32 to vector<32x256xf32>
    %12 = arith.mulf %11, %3 : vector<32x256xf32>
    %13 = arith.mulf %12, %3 : vector<32x256xf32>
    %cst_10 = arith.constant 1.000000e+00 : f32
    %14 = vector.broadcast %cst_10 : f32 to vector<32x256xf32>
    %15 = arith.addf %14, %13 : vector<32x256xf32>
    %16 = arith.mulf %10, %15 : vector<32x256xf32>
    %17 = math.tanh %16 : vector<32x256xf32>
    %cst_11 = arith.constant 1.000000e+00 : f32
    %18 = vector.broadcast %cst_11 : f32 to vector<32x256xf32>
    %19 = arith.addf %18, %17 : vector<32x256xf32>
    %20 = arith.mulf %8, %19 : vector<32x256xf32>
    %21 = arith.mulf %20, %6 : vector<32x256xf32>
    %c0_12 = arith.constant 0 : index
    %c0_13 = arith.constant 0 : index
    %22 = vector.load %arg4[%c0_12, %c0_13] : memref<32x256xf32, #tpu.memory_space<vmem>>, vector<32x256xf32>
    tpu.vector_store %arg4[%c0_12, %c0_13], %21 {strides = array<i32>} : memref<32x256xf32, #tpu.memory_space<vmem>>, vector<32x256xf32>,
    return
  }
  func.func @transform_0(%arg0: i32, %arg1: i32) -> (i32, i32) {
    %c0_i32 = arith.constant 0 : i32
    %c0_i32_0 = arith.constant 0 : i32
    return %arg1, %c0_i32 : i32, i32
  }
  func.func @transform_1(%arg0: i32, %arg1: i32) -> (i32, i32, i32) {
    %c0_i32 = arith.constant 0 : i32
    %c0_i32_0 = arith.constant 0 : i32
    %c0_i32_1 = arith.constant 0 : i32
    return %c0_i32, %c0_i32_0, %arg0 : i32, i32, i32
  }
  func.func @transform_2(%arg0: i32, %arg1: i32) -> (i32, i32) {
    %c0_i32 = arith.constant 0 : i32
    return %arg1, %arg0 : i32, i32
  }
}

</mosaic_0001>

<bundles_post_ra>
// kernel: tpu_custom_call.1
= control target key start
LH: loop header
LB: loop body
LE: loop exit
PB: predicated region body
PF: predicated region fallthrough
CT: control target
= control target key end

     0   :  { %7 = vsyncpa [#allocation3], 0  ;;  %s656_s0 = inlined_call_operand.hbm [shape: f32[32,128], index: 0, kind: input, shape index: {}]   ;;  %s657_s1 = inlined_call_operand.hbm [shape: f32[2,128,256], index: 1, kind: input, shape index: {}]   ;;  %s658_s2 = inlined_call_operand.hbm [shape: f32[32,256], index: 2, kind: output, shape index: {}]  }
   0x1   :  { %8 = vsyncpa [#allocation6], 0 }
   0x2   :  { %9 = vsyncpa [#allocation4], 0  ;;  %s553_s9 = smov [#allocation2]   ;;  %s481_s13 = scalar_lea.hbm %s656_s0, 512 }
   0x3   :  { %s15_s10 = sshll.u32 %s553_s9, 4  ;;  %p482_p0 = scmp.ne.s32.totalorder %s656_s0, %s481_s13  ;;  %s16_s10 = int_to_ptr.vmem [resolvable:$true] %s15_s10 }
   0x4   :  { %p485_p1 = scmp.lt.u32.totalorder %s481_s13, %s656_s0 }
   0x6   :  { %p487_p2 = pnand %p485_p1, %p482_p0 }
   0x8   :  { %490 = shalt.err (!%p487_p2)
}
   0x9   :  { %s491_s18 = scalar_lea.vmem %s16_s10, 512  ;;  %p496_p4 = scmp.lt.s32.totalorder %s16_s10, %s16_s10 }
   0xa   :  { %p492_p3 = scmp.ne.s32.totalorder %s16_s10, %s491_s18  ;;  %p497_p5 = scmp.lt.s32.totalorder %s491_s18, %s491_s18 }
   0xc   :  { %p498_p6 = por %p497_p5, %p496_p4 }
   0xe   :  { %p499_p7 = pnand %p498_p6, %p492_p3 }
  0x10   :  { %502 = shalt.err (!%p499_p7)
}
  0x11   :  { %s554_s19 = smov 128   ;;  %s555_s20 = smov 8  }
  0x12   :  { %21 = dma.hbm_to_vmem [thread:$0]  %s656_s0, 512, %s16_s10, [#allocation3], %s554_s19, %s554_s19, %s555_s20  }
  0x13   :  { %s556_s23 = smov [#allocation5]   ;;  %s503_s27 = scalar_lea.hbm %s657_s1, 8192 }
  0x14   :  { %s27_s24 = sshll.u32 %s556_s23, 4  ;;  %p504_p8 = scmp.ne.s32.totalorder %s657_s1, %s503_s27  ;;  %s28_s24 = int_to_ptr.vmem [resolvable:$true] %s27_s24 }
  0x15   :  { %p507_p9 = scmp.lt.u32.totalorder %s503_s27, %s657_s1 }
  0x17   :  { %p509_p10 = pnand %p507_p9, %p504_p8 }
  0x19   :  { %512 = shalt.err (!%p509_p10)
}
  0x1a   :  { %s513_s4 = scalar_lea.vmem %s28_s24, 8192  ;;  %p518_p12 = scmp.lt.s32.totalorder %s28_s24, %s28_s24 }
  0x1b   :  { %p514_p11 = scmp.ne.s32.totalorder %s28_s24, %s513_s4  ;;  %p519_p13 = scmp.lt.s32.totalorder %s513_s4, %s513_s4 }
  0x1d   :  { %p520_p0 = por %p519_p13, %p518_p12 }
  0x1f   :  { %p521_p1 = pnand %p520_p0, %p514_p11 }
  0x21   :  { %524 = shalt.err (!%p521_p1)
}
  0x22   :  { %s557_s0 = smov 256   ;;  %s558_s5 = smov 16  }
  0x23   :  { %33 = dma.hbm_to_vmem [thread:$0]  %s657_s1, 8192, %s28_s24, [#allocation6], %s557_s0, %s557_s0, %s558_s5  }
  0x24   :  { %547 = dma.done.wait [#allocation3], 512  }
  0x25   :  { %548 = vsyncadd [#allocation3], 4294966784 }
  0x26   :  { %549 = dma.done.wait [#allocation6], 8192  }
  0x27   :  { %550 = vsyncadd [#allocation6], 4294959104  ;;  %v559_v0 = vmov 0.0   ;;  %v45_v1 = vld [vmem:[#allocation5 + $0x8] sm:$0xff]  ;;  %v47_v2 = vld [vmem:[#allocation5 + $0x18] sm:$0xff]  ;;  %s560_s1 = smov [#allocation7]  }
  0x28   :  { %140 = vmatprep.mubr.f32.mxu0 %v559_v0  ;;  %262 = vmatprep.mubr.f32.mxu1 %v559_v0  ;;  %v44_v3 = vld [vmem:[#allocation5] sm:$0xff]  ;;  %v393_v4 = vpack.c.bf16 %v47_v2, %v45_v1  ;;  %v46_v5 = vld [vmem:[#allocation5 + $0x10] sm:$0xff]  ;;  %v49_v6 = vld [vmem:[#allocation5 + $0x28] sm:$0xff]  ;;  %s380_s8 = sshll.u32 %s560_s1, 4  ;;  %s381_s8 = int_to_ptr.vmem [resolvable:$true] %s380_s8 }
  0x29   :  { %v51_v7 = vld [vmem:[#allocation5 + $0x38] sm:$0xff]  ;;  %v395_v8 = vpack.c.bf16 %v46_v5, %v44_v3  ;;  %v48_v10 = vld [vmem:[#allocation5 + $0x20] sm:$0xff]  ;;  %v50_v11 = vld [vmem:[#allocation5 + $0x30] sm:$0xff]  ;;  %s525_s9 = scalar_lea.vmem %s381_s8, 1024  ;;  %p530_p3 = scmp.lt.s32.totalorder %s381_s8, %s381_s8 }
  0x2a   :  { %v397_v9 = vpack.c.bf16 %v51_v7, %v49_v6  ;;  %v53_v12 = vld [vmem:[#allocation5 + $0x48] sm:$0xff]  ;;  %394 = vmatprep.subr.bf16.mxu0 %v393_v4  ;;  %v55_v13 = vld [vmem:[#allocation5 + $0x58] sm:$0xff]  ;;  %v399_v14 = vpack.c.bf16 %v50_v11, %v48_v10  ;;  %v52_v16 = vld [vmem:[#allocation5 + $0x40] sm:$0xff]  ;;  %p526_p2 = scmp.ne.s32.totalorder %s381_s8, %s525_s9  ;;  %p531_p4 = scmp.lt.s32.totalorder %s525_s9, %s525_s9 }
  0x2b   :  { %396 = vmatpush1.bf16.msra.mxu0 %v395_v8  ;;  %v401_v15 = vpack.c.bf16 %v55_v13, %v53_v12  ;;  %v54_v17 = vld [vmem:[#allocation5 + $0x50] sm:$0xff]  ;;  %v57_v18 = vld [vmem:[#allocation5 + $0x68] sm:$0xff]  ;;  %v59_v19 = vld [vmem:[#allocation5 + $0x78] sm:$0xff] }
  0x2c   :  { %398 = vmatprep.subr.bf16.mxu0 %v397_v9  ;;  %v403_v20 = vpack.c.bf16 %v54_v17, %v52_v16  ;;  %v167_v21 = vld [vmem:[#allocation5 + $0x108] sm:$0xff]  ;;  %v169_v22 = vld [vmem:[#allocation5 + $0x118] sm:$0xff]  ;;  %v166_v23 = vld [vmem:[#allocation5 + $0x100] sm:$0xff]  ;;  %v405_v24 = vpack.c.bf16 %v59_v19, %v57_v18  ;;  %p532_p5 = por %p531_p4, %p530_p3 }
  0x2d   :  { %v56_v25 = vld [vmem:[#allocation5 + $0x60] sm:$0xff]  ;;  %v58_v26 = vld [vmem:[#allocation5 + $0x70] sm:$0xff]  ;;  %v425_v27 = vpack.c.bf16 %v169_v22, %v167_v21  ;;  %v61_v29 = vld [vmem:[#allocation5 + $0x88] sm:$0xff] }
  0x2e   :  { %v168_v28 = vld [vmem:[#allocation5 + $0x110] sm:$0xff]  ;;  %v63_v30 = vld [vmem:[#allocation5 + $0x98] sm:$0xff]  ;;  %v171_v32 = vld [vmem:[#allocation5 + $0x128] sm:$0xff]  ;;  %v407_v36 = vpack.c.bf16 %v58_v26, %v56_v25  ;;  %p533_p6 = pnand %p532_p5, %p526_p2 }
  0x2f   :  { %400 = vmatpush1.bf16.msra.mxu0 %v399_v14  ;;  %v427_v31 = vpack.c.bf16 %v168_v28, %v166_v23  ;;  %426 = vmatprep.subr.bf16.mxu1 %v425_v27  ;;  %v173_v33 = vld [vmem:[#allocation5 + $0x138] sm:$0xff]  ;;  %v170_v34 = vld [vmem:[#allocation5 + $0x120] sm:$0xff]  ;;  %v172_v35 = vld [vmem:[#allocation5 + $0x130] sm:$0xff]  ;;  %v409_v41 = vpack.c.bf16 %v63_v30, %v61_v29 }
  0x30   :  { %402 = vmatprep.subr.bf16.mxu0 %v401_v15  ;;  %v60_v37 = vld [vmem:[#allocation5 + $0x80] sm:$0xff]  ;;  %v62_v38 = vld [vmem:[#allocation5 + $0x90] sm:$0xff]  ;;  %v429_v39 = vpack.c.bf16 %v173_v33, %v171_v32  ;;  %v431_v40 = vpack.c.bf16 %v172_v35, %v170_v34  ;;  %v65_v42 = vld [vmem:[#allocation5 + $0xa8] sm:$0xff] }
  0x31   :  { %428 = vmatpush1.bf16.msra.mxu1 %v427_v31  ;;  %v175_v43 = vld [vmem:[#allocation5 + $0x148] sm:$0xff]  ;;  %v177_v44 = vld [vmem:[#allocation5 + $0x158] sm:$0xff]  ;;  %v174_v47 = vld [vmem:[#allocation5 + $0x140] sm:$0xff]  ;;  %v411_v51 = vpack.c.bf16 %v62_v38, %v60_v37 }
  0x32   :  { %v67_v45 = vld [vmem:[#allocation5 + $0xb8] sm:$0xff]  ;;  %430 = vmatprep.subr.bf16.mxu1 %v429_v39  ;;  %v433_v46 = vpack.c.bf16 %v177_v44, %v175_v43  ;;  %v176_v48 = vld [vmem:[#allocation5 + $0x150] sm:$0xff]  ;;  %v179_v49 = vld [vmem:[#allocation5 + $0x168] sm:$0xff] }
  0x33   :  { %404 = vmatpush1.bf16.msra.mxu0 %v403_v20  ;;  %v181_v50 = vld [vmem:[#allocation5 + $0x178] sm:$0xff]  ;;  %v64_v52 = vld [vmem:[#allocation5 + $0xa0] sm:$0xff]  ;;  %v66_v53 = vld [vmem:[#allocation5 + $0xb0] sm:$0xff]  ;;  %v435_v54 = vpack.c.bf16 %v176_v48, %v174_v47  ;;  %v413_v55 = vpack.c.bf16 %v67_v45, %v65_v42 }
  0x34   :  { %406 = vmatprep.subr.bf16.mxu0 %v405_v24  ;;  %v69_v56 = vld [vmem:[#allocation5 + $0xc8] sm:$0xff]  ;;  %v437_v57 = vpack.c.bf16 %v181_v50, %v179_v49  ;;  %v178_v58 = vld [vmem:[#allocation5 + $0x160] sm:$0xff]  ;;  %v180_v59 = vld [vmem:[#allocation5 + $0x170] sm:$0xff]  ;;  %v415_v63 = vpack.c.bf16 %v66_v53, %v64_v52 }
  0x35   :  { %432 = vmatpush1.bf16.msra.mxu1 %v431_v40  ;;  %v71_v60 = vld [vmem:[#allocation5 + $0xd8] sm:$0xff]  ;;  %v183_v61 = vld [vmem:[#allocation5 + $0x188] sm:$0xff]  ;;  %v68_v1 = vld [vmem:[#allocation5 + $0xc0] sm:$0xff]  ;;  %v439_v3 = vpack.c.bf16 %v180_v59, %v178_v58 }
  0x36   :  { %434 = vmatprep.subr.bf16.mxu1 %v433_v46  ;;  %v185_v62 = vld [vmem:[#allocation5 + $0x198] sm:$0xff]  ;;  %v70_v2 = vld [vmem:[#allocation5 + $0xd0] sm:$0xff]  ;;  %v417_v4 = vpack.c.bf16 %v71_v60, %v69_v56  ;;  %v73_v5 = vld [vmem:[#allocation5 + $0xe8] sm:$0xff] }
  0x37   :  { %408 = vmatpush1.bf16.msra.mxu0 %v407_v36  ;;  %v441_v6 = vpack.c.bf16 %v185_v62, %v183_v61  ;;  %v182_v7 = vld [vmem:[#allocation5 + $0x180] sm:$0xff]  ;;  %v184_v8 = vld [vmem:[#allocation5 + $0x190] sm:$0xff]  ;;  %v75_v9 = vld [vmem:[#allocation5 + $0xf8] sm:$0xff]  ;;  %v419_v12 = vpack.c.bf16 %v70_v2, %v68_v1 }
  0x38   :  { %410 = vmatprep.subr.bf16.mxu0 %v409_v41  ;;  %v187_v10 = vld [vmem:[#allocation5 + $0x1a8] sm:$0xff]  ;;  %v189_v11 = vld [vmem:[#allocation5 + $0x1b8] sm:$0xff]  ;;  %v72_v13 = vld [vmem:[#allocation5 + $0xe0] sm:$0xff]  ;;  %v443_v14 = vpack.c.bf16 %v184_v8, %v182_v7  ;;  %v421_v15 = vpack.c.bf16 %v75_v9, %v73_v5 }
  0x39   :  { %436 = vmatpush1.bf16.msra.mxu1 %v435_v54  ;;  %v74_v16 = vld [vmem:[#allocation5 + $0xf0] sm:$0xff]  ;;  %v445_v17 = vpack.c.bf16 %v189_v11, %v187_v10  ;;  %v186_v18 = vld [vmem:[#allocation5 + $0x1a0] sm:$0xff]  ;;  %v191_v20 = vld [vmem:[#allocation5 + $0x1c8] sm:$0xff] }
  0x3a   :  { %438 = vmatprep.subr.bf16.mxu1 %v437_v57  ;;  %v188_v19 = vld [vmem:[#allocation5 + $0x1b0] sm:$0xff]  ;;  %v193_v21 = vld [vmem:[#allocation5 + $0x1d8] sm:$0xff]  ;;  %v423_v22 = vpack.c.bf16 %v74_v16, %v72_v13  ;;  %v190_v25 = vld [vmem:[#allocation5 + $0x1c0] sm:$0xff] }
  0x3b   :  { %412 = vmatpush1.bf16.msra.mxu0 %v411_v51  ;;  %v447_v23 = vpack.c.bf16 %v188_v19, %v186_v18  ;;  %v449_v24 = vpack.c.bf16 %v193_v21, %v191_v20  ;;  %v192_v26 = vld [vmem:[#allocation5 + $0x1d0] sm:$0xff]  ;;  %v195_v27 = vld [vmem:[#allocation5 + $0x1e8] sm:$0xff]  ;;  %v197_v28 = vld [vmem:[#allocation5 + $0x1f8] sm:$0xff] }
  0x3c   :  { %414 = vmatprep.subr.bf16.mxu0 %v413_v55  ;;  %v40_v29 = vld [vmem:[#allocation2] sm:$0xff]  ;;  %v451_v30 = vpack.c.bf16 %v192_v26, %v190_v25  ;;  %v453_v31 = vpack.c.bf16 %v197_v28, %v195_v27  ;;  %v196_v33 = vld [vmem:[#allocation5 + $0x1f0] sm:$0xff]  ;;  %v41_v34 = vld [vmem:[#allocation2 + $0x8] sm:$0xff] }
  0x3d   :  { %440 = vmatpush1.bf16.msra.mxu1 %v439_v3  ;;  %v194_v32 = vld [vmem:[#allocation5 + $0x1e0] sm:$0xff]  ;;  %v42_v36 = vld [vmem:[#allocation2 + $0x10] sm:$0xff]  ;;  %v43_v37 = vld [vmem:[#allocation2 + $0x18] sm:$0xff] }
  0x3e   :  { %442 = vmatprep.subr.bf16.mxu1 %v441_v6  ;;  %v455_v35 = vpack.c.bf16 %v196_v33, %v194_v32 }
  0x3f   :  { %416 = vmatpush1.bf16.msra.mxu0 %v415_v63 }
  0x40   :  { %418 = vmatprep.subr.bf16.mxu0 %v417_v4 }
  0x41   :  { %444 = vmatpush1.bf16.msra.mxu1 %v443_v14 }
  0x42   :  { %446 = vmatprep.subr.bf16.mxu1 %v445_v17 }
  0x43   :  { %420 = vmatpush1.bf16.msra.mxu0 %v419_v12 }
  0x44   :  { %422 = vmatprep.subr.bf16.mxu0 %v421_v15 }
  0x45   :  { %448 = vmatpush1.bf16.msra.mxu1 %v447_v23 }
  0x46   :  { %450 = vmatprep.subr.bf16.mxu1 %v449_v24 }
  0x47   :  { %424 = vmatpush1.bf16.msra.mxu0 %v423_v22 }
  0x49   :  { %452 = vmatpush1.bf16.msra.mxu1 %v451_v30 }
  0x4a   :  { %141 = vmatmul.mubr.f32.vlgmr.msra.gmra.mrb[0].mxu0 %v40_v29  ;;  %454 = vmatprep.subr.bf16.mxu1 %v453_v31 }
  0x4b   :  { %146 = vmatprep.mubr.f32.mxu0 %v559_v0 }
  0x4d   :  { %456 = vmatpush1.bf16.msra.mxu1 %v455_v35 }
  0x4e   :  { %147 = vmatmul.mubr.f32.gmra.mrb[2].mxu0 %v41_v34 }
  0x4f   :  { %152 = vmatprep.mubr.f32.mxu0 %v559_v0 }
  0x50   :  { %263 = vmatmul.mubr.f32.vlgmr.msra.gmra.mrb[0].mxu1 %v40_v29 }
  0x51   :  { %268 = vmatprep.mubr.f32.mxu1 %v559_v0 }
  0x52   :  { %153 = vmatmul.mubr.f32.gmra.mrb[4].mxu0 %v42_v36 }
  0x53   :  { %158 = vmatprep.mubr.f32.mxu0 %v559_v0 }
  0x54   :  { %269 = vmatmul.mubr.f32.gmra.mrb[2].mxu1 %v41_v34 }
  0x55   :  { %274 = vmatprep.mubr.f32.mxu1 %v559_v0 }
  0x56   :  { %159 = vmatmul.mubr.f32.gmra.mrb[6].mxu0 %v43_v37 }
  0x58   :  { %275 = vmatmul.mubr.f32.gmra.mrb[4].mxu1 %v42_v36 }
  0x59   :  { %280 = vmatprep.mubr.f32.mxu1 %v559_v0 }
  0x5c   :  { %281 = vmatmul.mubr.f32.gmra.mrb[6].mxu1 %v43_v37 }
 0x11d   :  { %v142_v38 = vpop.f32.mrb[0].mxu0 }
 0x11e   :  { %v303_v39 = vmul.f32 0.044715, %v142_v38  ;;  %v144_v40 = vpop.f32.mrb[1].mxu0  ;;  %v295_v45 = vmul.f32 0.7978846, %v142_v38  ;;  %v287_v30 = vmul.f32 0.5, %v142_v38 }
 0x11f   :  { %v304_v41 = vmul.f32 0.044715, %v144_v40  ;;  %v296_v49 = vmul.f32 0.7978846, %v144_v40  ;;  %v288_v33 = vmul.f32 0.5, %v144_v40 }
 0x120   :  { %v311_v42 = vmul.f32 %v303_v39, %v142_v38 }
 0x121   :  { %v312_v43 = vmul.f32 %v304_v41, %v144_v40  ;;  %v611_v44 = vpop.f32.mrb[2].mxu0 }
 0x122   :  { %v319_v46 = vadd.f32 1.0, %v311_v42  ;;  %v305_v47 = vmul.f32 0.044715, %v611_v44  ;;  %v614_v48 = vpop.f32.mrb[3].mxu0  ;;  %v297_v57 = vmul.f32 0.7978846, %v611_v44 }
 0x123   :  { %v320_v50 = vadd.f32 1.0, %v312_v43  ;;  %v306_v51 = vmul.f32 0.044715, %v614_v48  ;;  %v264_v55 = vpop.f32.mrb[0].mxu1  ;;  %v298_v61 = vmul.f32 0.7978846, %v614_v48 }
 0x124   :  { %v313_v0 = vmul.f32 %v305_v47, %v611_v44  ;;  %v327_v52 = vmul.f32 %v319_v46, %v295_v45  ;;  %v266_v1 = vpop.f32.mrb[1].mxu1  ;;  %v289_v42 = vmul.f32 0.5, %v611_v44  ;;  %v290_v38 = vmul.f32 0.5, %v614_v48 }
 0x125   :  { %v314_v53 = vmul.f32 %v306_v51, %v614_v48  ;;  %v619_v54 = vpop.f32.mrb[4].mxu0  ;;  %v328_v56 = vmul.f32 %v320_v50, %v296_v49 }
 0x126   :  { %v321_v58 = vadd.f32 1.0, %v313_v0  ;;  %v307_v59 = vmul.f32 0.044715, %v619_v54  ;;  %v623_v60 = vpop.f32.mrb[5].mxu0  ;;  %465 = vtanh.f32 %v327_v52  ;;  %v299_v8 = vmul.f32 0.7978846, %v619_v54 }
 0x127   :  { %v322_v62 = vadd.f32 1.0, %v314_v53  ;;  %v308_v63 = vmul.f32 0.044715, %v623_v60  ;;  %467 = vtanh.f32 %v328_v56  ;;  %v270_v6 = vpop.f32.mrb[2].mxu1  ;;  %v300_v12 = vmul.f32 0.7978846, %v623_v60 }
 0x128   :  { %v315_v2 = vmul.f32 %v307_v59, %v619_v54  ;;  %v329_v3 = vmul.f32 %v321_v58, %v297_v57  ;;  %v272_v16 = vpop.f32.mrb[3].mxu1  ;;  %v291_v52 = vmul.f32 0.5, %v619_v54 }
 0x129   :  { %v316_v4 = vmul.f32 %v308_v63, %v623_v60  ;;  %v629_v5 = vpop.f32.mrb[6].mxu0  ;;  %v330_v7 = vmul.f32 %v322_v62, %v298_v61 }
 0x12a   :  { %v323_v9 = vadd.f32 1.0, %v315_v2  ;;  %v309_v10 = vmul.f32 0.044715, %v629_v5  ;;  %v162_v11 = vpop.f32.mrb[7].mxu0  ;;  %469 = vtanh.f32 %v329_v3  ;;  %v301_v21 = vmul.f32 0.7978846, %v629_v5 }
 0x12b   :  { %v324_v13 = vadd.f32 1.0, %v316_v4  ;;  %v310_v14 = vmul.f32 0.044715, %v162_v11  ;;  %471 = vtanh.f32 %v330_v7  ;;  %v276_v19 = vpop.f32.mrb[4].mxu1  ;;  %v302_v24 = vmul.f32 0.7978846, %v162_v11 }
 0x12c   :  { %v317_v15 = vmul.f32 %v309_v10, %v629_v5  ;;  %v331_v17 = vmul.f32 %v323_v9, %v299_v8  ;;  %v278_v23 = vpop.f32.mrb[5].mxu1  ;;  %v293_v62 = vmul.f32 0.5, %v629_v5 }
 0x12d   :  { %v318_v18 = vmul.f32 %v310_v14, %v162_v11  ;;  %v332_v20 = vmul.f32 %v324_v13, %v300_v12 }
 0x12e   :  { %v325_v22 = vadd.f32 1.0, %v317_v15  ;;  %473 = vtanh.f32 %v331_v17 }
 0x12f   :  { %v326_v25 = vadd.f32 1.0, %v318_v18  ;;  %475 = vtanh.f32 %v332_v20  ;;  %v282_v32 = vpop.f32.mrb[6].mxu1 }
 0x130   :  { %v466_v26 = vpop.eup %465  ;;  %v333_v27 = vmul.f32 %v325_v22, %v301_v21  ;;  %v284_v35 = vpop.f32.mrb[7].mxu1 }
 0x131   :  { %v468_v28 = vpop.eup %467  ;;  %v334_v29 = vmul.f32 %v326_v25, %v302_v24  ;;  %v343_v31 = vadd.f32 1.0, %v466_v26 }
 0x132   :  { %v344_v34 = vadd.f32 1.0, %v468_v28  ;;  %477 = vtanh.f32 %v333_v27 }
 0x133   :  { %479 = vtanh.f32 %v334_v29  ;;  %v351_v36 = vmul.f32 %v343_v31, %v287_v30 }
 0x134   :  { %v470_v37 = vpop.eup %469  ;;  %v352_v39 = vmul.f32 %v344_v34, %v288_v33 }
 0x135   :  { %v359_v41 = vmul.f32 %v351_v36, %v264_v55  ;;  %v345_v43 = vadd.f32 1.0, %v470_v37  ;;  %v472_v45 = vpop.eup %471  ;;  %v292_v55 = vmul.f32 0.5, %v623_v60 }
 0x136   :  { %v360_v46 = vmul.f32 %v352_v39, %v266_v1  ;;  %v346_v49 = vadd.f32 1.0, %v472_v45  ;;  %v294_v1 = vmul.f32 0.5, %v162_v11 }
 0x137   :  { %367 = vst [vmem:[#allocation7] sm:$0xff] %v359_v41  ;;  %v353_v47 = vmul.f32 %v345_v43, %v289_v42 }
 0x138   :  { %v474_v50 = vpop.eup %473  ;;  %368 = vst [vmem:[#allocation7 + $0x8] sm:$0xff] %v360_v46  ;;  %v354_v0 = vmul.f32 %v346_v49, %v290_v38 }
 0x139   :  { %v476_v40 = vpop.eup %475  ;;  %v361_v51 = vmul.f32 %v353_v47, %v270_v6  ;;  %v347_v53 = vadd.f32 1.0, %v474_v50 }
 0x13a   :  { %v348_v56 = vadd.f32 1.0, %v476_v40  ;;  %v362_v44 = vmul.f32 %v354_v0, %v272_v16 }
 0x13b   :  { %369 = vst [vmem:[#allocation7 + $0x10] sm:$0xff] %v361_v51  ;;  %v355_v57 = vmul.f32 %v347_v53, %v291_v52 }
 0x13c   :  { %v478_v58 = vpop.eup %477  ;;  %v356_v59 = vmul.f32 %v348_v56, %v292_v55  ;;  %370 = vst [vmem:[#allocation7 + $0x18] sm:$0xff] %v362_v44 }
 0x13d   :  { %v480_v61 = vpop.eup %479  ;;  %v363_v48 = vmul.f32 %v355_v57, %v276_v19  ;;  %v349_v63 = vadd.f32 1.0, %v478_v58 }
 0x13e   :  { %v364_v2 = vmul.f32 %v356_v59, %v278_v23  ;;  %v350_v3 = vadd.f32 1.0, %v480_v61 }
 0x13f   :  { %371 = vst [vmem:[#allocation7 + $0x20] sm:$0xff] %v363_v48  ;;  %v357_v54 = vmul.f32 %v349_v63, %v293_v62 }
 0x140   :  { %372 = vst [vmem:[#allocation7 + $0x28] sm:$0xff] %v364_v2  ;;  %v358_v60 = vmul.f32 %v350_v3, %v294_v1 }
 0x141   :  { %v365_v4 = vmul.f32 %v357_v54, %v282_v32 }
 0x142   :  { %v366_v6 = vmul.f32 %v358_v60, %v284_v35 }
 0x143   :  { %373 = vst [vmem:[#allocation7 + $0x30] sm:$0xff] %v365_v4 }
 0x144   :  { %374 = vst [vmem:[#allocation7 + $0x38] sm:$0xff] %v366_v6 }
 0x145   :  { %536 = shalt.err (!%p533_p6)
}
 0x146   :  { %s537_s12 = scalar_lea.hbm %s658_s2, 1024 }
 0x147   :  { %p538_p7 = scmp.ne.s32.totalorder %s658_s2, %s537_s12  ;;  %p541_p8 = scmp.lt.u32.totalorder %s537_s12, %s658_s2 }
 0x149   :  { %p543_p9 = pnand %p541_p8, %p538_p7 }
 0x14b   :  { %546 = shalt.err (!%p543_p9)
}
 0x14c   :  { %386 = dma.vmem_to_hbm [thread:$0]  %s381_s8, 1024, %s658_s2, [#allocation4], %s557_s0, %s557_s0, %s558_s5  }
 0x14d   :  { %551 = dma.done.wait [#allocation4], 1024  }
 0x14e   :  { %552 = vsyncadd [#allocation4], 4294966272 }
 0x14f   :  { %390 = vsyncpa [#allocation3], 1 }
 0x150   :  { %391 = vsyncpa [#allocation6], 1 }
 0x151   :  { %392 = vsyncpa [#allocation4], 1 }

</bundles_post_ra>
